<compile_context>
chip_gen: v6e
topology: v6e:2x2x1
jax: 0.10.0
libtpu: 0.0.40
codegen_flags: <defaults>
</compile_context>

<pallas_src>
import functools

import jax
import jax.numpy as jnp
from jax.experimental import pallas as pl
from jax.experimental.pallas import tpu as pltpu


_LANE_W = 512           # lane-dense width (multiple of 128)
_MAX_BLOCK_ROWS = 2048  # up to ~4 MiB f32 per input block
_NUM_CORES = 2          # leading "parallel" grid axis (v7x: 2 TCs; harmless elsewhere)


def _sdf_loss_kernel(o_ref, t_ref, out_ref, acc1_ref, acc3_ref, *, sdf_scale):
    k = pl.program_id(1)

    @pl.when(k == 0)
    def _():
        acc1_ref[...] = jnp.zeros_like(acc1_ref)
        acc3_ref[...] = jnp.zeros_like(acc3_ref)

    o = o_ref[...].astype(jnp.float32)
    t = t_ref[...].astype(jnp.float32)

    d1 = t * sdf_scale - o
    sq = d1 * d1
    eq = ((t > 0.5) == (o > 0.5)).astype(jnp.float32)

    rows, w = o.shape
    # Fold the (rows, W) tile into vreg-shaped (8, W) accumulators with pure
    # elementwise adds (no per-step cross-lane/XLU reduction, no (1,1) stores).
    acc1_ref[...] += jnp.sum(sq.reshape(rows // 8, 8, w), axis=0)
    acc3_ref[...] += jnp.sum(eq.reshape(rows // 8, 8, w), axis=0)

    @pl.when(k == pl.num_programs(1) - 1)
    def _():
        # One full reduce per core, only at the very end.
        s1 = jnp.sum(acc1_ref[...])
        s3 = jnp.sum(acc3_ref[...])
        lane = jax.lax.broadcasted_iota(jnp.int32, out_ref.shape, 1)
        out_ref[...] = jnp.where(lane == 0, s1, jnp.where(lane == 1, s3, 0.0))


def sdf_loss_cross_entropy(outputs, targets, *, sdf_scale):
    """Pallas implementation of SDFLoss_Cross_Entropy.forward."""
    assert outputs.shape == targets.shape
    orig_shape = outputs.shape

    n_elems = 1
    for d in orig_shape:
        n_elems *= d
    n_rows = max(1, n_elems // orig_shape[-1])  # rows for the sum(-1)-then-mean

    W = _LANE_W
    rows_needed = pl.cdiv(n_elems, W)
    rows_per_core = pl.cdiv(rows_needed, _NUM_CORES)
    block_rows = max(8, min(_MAX_BLOCK_ROWS, 8 * pl.cdiv(rows_per_core, 8)))
    blocks_per_core = pl.cdiv(rows_per_core, block_rows)
    rows_padded = _NUM_CORES * blocks_per_core * block_rows
    n_total = rows_padded * W
    n_pad = n_total - n_elems

    def _flat_pad(x):
        x = x.reshape(-1)
        if n_pad:
            x = jnp.pad(x, (0, n_pad))  # zero pad: d1 contribution 0, eq contribution +1
        return x.reshape(rows_padded, W)

    o2 = _flat_pad(outputs)
    t2 = _flat_pad(targets)

    kernel = functools.partial(_sdf_loss_kernel, sdf_scale=float(sdf_scale))

    def _in_spec():
        return pl.BlockSpec((block_rows, W),
                            lambda c, k: (c * blocks_per_core + k, 0))

    partials = pl.pallas_call(
        kernel,
        out_shape=jax.ShapeDtypeStruct((_NUM_CORES * 8, 128), jnp.float32),
        grid_spec=pltpu.PrefetchScalarGridSpec(
            num_scalar_prefetch=0,
            grid=(_NUM_CORES, blocks_per_core),
            in_specs=[_in_spec(), _in_spec()],
            out_specs=pl.BlockSpec((8, 128), lambda c, k: (c, 0)),
            scratch_shapes=[
                pltpu.VMEM((8, W), jnp.float32),
                pltpu.VMEM((8, W), jnp.float32),
            ],
        ),
        compiler_params=pltpu.CompilerParams(
            dimension_semantics=("parallel", "arbitrary"),
            vmem_limit_bytes=48 * 1024 * 1024,  # sized for v7x's 64 MiB VMEM
        ),
    )(o2, t2)

    # Combine the per-core partial sums (tiny, outside the kernel).
    s1 = jnp.sum(partials[0::8, 0])   # sum_all((t*scale - o)^2), pads contribute 0
    s3 = jnp.sum(partials[0::8, 1])   # sign-agreement count incl. pads (+1 each)

    scale = float(sdf_scale)
    sdf_loss = s1 / float(n_rows)
    rv = (s1 / (scale * scale)) / float(n_elems) * 10000.0
    acc = (s3 - float(n_pad)) / float(n_elems)

    return {
        "sdf_loss": sdf_loss,
        "ignore_sdf_loss_realvalue": rv,
        "ignore_sdf_accuracy": acc,
    }


def _reference(outputs, targets, sdf_scale):
    o = outputs.astype(jnp.float32)
    t = targets.astype(jnp.float32)
    sdf_loss = jnp.mean(jnp.sum((t * sdf_scale - o) ** 2, axis=-1))
    rv = jnp.mean((t - o / sdf_scale) ** 2) * 10000.0
    acc = jnp.mean(((t > 0.5) == (o > 0.5)).astype(jnp.float32))
    return sdf_loss, rv, acc


if __name__ == "__main__":
    # Module has no learnable parameters; sdf_scale is a constructor hyperparam.
    sdf_scale = 100.0

    key = jax.random.PRNGKey(0)
    k1, k2, k3, k4 = jax.random.split(key, 4)

    # e.g. (batch=2, num_points=64, channels=8) SDF predictions / targets
    shape = (2, 64, 8)
    outputs = jax.random.normal(k1, shape, dtype=jnp.float32)
    targets = jax.random.uniform(k2, shape, dtype=jnp.float32) - 0.5

    res = sdf_loss_cross_entropy(outputs, targets, sdf_scale=sdf_scale)
    jax.block_until_ready(res)

    ref_loss, ref_rv, ref_acc = _reference(outputs, targets, sdf_scale)
    assert jnp.allclose(res["sdf_loss"], ref_loss, rtol=1e-5, atol=1e-3)
    assert jnp.allclose(res["ignore_sdf_loss_realvalue"], ref_rv, rtol=1e-5, atol=1e-3)
    assert jnp.allclose(res["ignore_sdf_accuracy"], ref_acc, rtol=1e-6, atol=1e-6)

    # Ragged (non lane/tile aligned) shape exercises the padding + count-correction path.
    shape2 = (3, 37, 5)
    outputs2 = jax.random.normal(k3, shape2, dtype=jnp.float32)
    targets2 = jax.random.uniform(k4, shape2, dtype=jnp.float32) - 0.5
    res2 = sdf_loss_cross_entropy(outputs2, targets2, sdf_scale=sdf_scale)
    jax.block_until_ready(res2)
    ref2_loss, ref2_rv, ref2_acc = _reference(outputs2, targets2, sdf_scale)
    assert jnp.allclose(res2["sdf_loss"], ref2_loss, rtol=1e-5, atol=1e-3)
    assert jnp.allclose(res2["ignore_sdf_loss_realvalue"], ref2_rv, rtol=1e-5, atol=1e-3)
    assert jnp.allclose(res2["ignore_sdf_accuracy"], ref2_acc, rtol=1e-6, atol=1e-6)

    print("KERNEL_OK")
</pallas_src>

<mosaic_0001>
module attributes {stable_mosaic.version = 11 : i64} {
  func.func @_sdf_loss_kernel(%arg0: i32, %arg1: i32, %arg2: memref<8x512xf32, #tpu.memory_space<vmem>>, %arg3: memref<8x512xf32, #tpu.memory_space<vmem>>, %arg4: memref<8x128xf32, #tpu.memory_space<vmem>>, %arg5: memref<8x512xf32, #tpu.memory_space<vmem>>, %arg6: memref<8x512xf32, #tpu.memory_space<vmem>>) attributes {dimension_semantics = [#tpu.dimension_semantics<parallel>, #tpu.dimension_semantics<arbitrary>], iteration_bounds = array<i64: 2, 1>, scalar_prefetch = 0 : i64, scratch_operands = 2 : i64, tpu.core_type = #tpu.core_type<tc>, window_params = [{transform_indices = @transform_0, window_bounds = array<i64: 8, 512>}, {transform_indices = @transform_1, window_bounds = array<i64: 8, 512>}, {transform_indices = @transform_2, window_bounds = array<i64: 8, 128>}]} {
    %c0_i32 = arith.constant 0 : i32
    %0 = arith.cmpi eq, %arg1, %c0_i32 : i32
    %1 = arith.extui %0 : i1 to i32
    %c0_i32_0 = arith.constant 0 : i32
    %2 = arith.cmpi ne, %1, %c0_i32_0 : i32
    scf.if %2 {
      %cst_19 = arith.constant 0.000000e+00 : f32
      %30 = vector.broadcast %cst_19 : f32 to vector<8x512xf32>
      %c0_20 = arith.constant 0 : index
      %c0_21 = arith.constant 0 : index
      %31 = vector.load %arg5[%c0_20, %c0_21] : memref<8x512xf32, #tpu.memory_space<vmem>>, vector<8x512xf32>
      tpu.vector_store %arg5[%c0_20, %c0_21], %30 {strides = array<i32>} : memref<8x512xf32, #tpu.memory_space<vmem>>, vector<8x512xf32>,
      %cst_22 = arith.constant 0.000000e+00 : f32
      %32 = vector.broadcast %cst_22 : f32 to vector<8x512xf32>
      %c0_23 = arith.constant 0 : index
      %c0_24 = arith.constant 0 : index
      %33 = vector.load %arg6[%c0_23, %c0_24] : memref<8x512xf32, #tpu.memory_space<vmem>>, vector<8x512xf32>
      tpu.vector_store %arg6[%c0_23, %c0_24], %32 {strides = array<i32>} : memref<8x512xf32, #tpu.memory_space<vmem>>, vector<8x512xf32>,
    } else {
    }
    %c0 = arith.constant 0 : index
    %c0_1 = arith.constant 0 : index
    %3 = vector.load %arg2[%c0, %c0_1] : memref<8x512xf32, #tpu.memory_space<vmem>>, vector<8x512xf32>
    %c0_2 = arith.constant 0 : index
    %c0_3 = arith.constant 0 : index
    %4 = vector.load %arg3[%c0_2, %c0_3] : memref<8x512xf32, #tpu.memory_space<vmem>>, vector<8x512xf32>
    %cst = arith.constant 1.000000e+02 : f32
    %5 = vector.broadcast %cst : f32 to vector<8x512xf32>
    %6 = arith.mulf %4, %5 : vector<8x512xf32>
    %7 = arith.subf %6, %3 : vector<8x512xf32>
    %8 = arith.mulf %7, %7 : vector<8x512xf32>
    %cst_4 = arith.constant 5.000000e-01 : f32
    %9 = vector.broadcast %cst_4 : f32 to vector<8x512xf32>
    %10 = arith.cmpf ogt, %4, %9 : vector<8x512xf32>
    %cst_5 = arith.constant 5.000000e-01 : f32
    %11 = vector.broadcast %cst_5 : f32 to vector<8x512xf32>
    %12 = arith.cmpf ogt, %3, %11 : vector<8x512xf32>
    %13 = arith.xori %10, %12 : vector<8x512xi1>
    %cst_6 = arith.constant dense<true> : vector<8x512xi1>
    %14 = arith.xori %13, %cst_6 : vector<8x512xi1>
    %15 = arith.extui %14 : vector<8x512xi1> to vector<8x512xi32>
    %16 = arith.sitofp %15 : vector<8x512xi32> to vector<8x512xf32>
    %c0_7 = arith.constant 0 : index
    %c0_8 = arith.constant 0 : index
    %17 = vector.load %arg5[%c0_7, %c0_8] : memref<8x512xf32, #tpu.memory_space<vmem>>, vector<8x512xf32>
    %18 = vector.shape_cast %8 : vector<8x512xf32> to vector<1x8x512xf32>
    %cst_9 = arith.constant dense<0.000000e+00> : vector<8x512xf32>
    %19 = vector.multi_reduction <add>, %18, %cst_9 [0] : vector<1x8x512xf32> to vector<8x512xf32>
    %20 = arith.addf %17, %19 : vector<8x512xf32>
    %c0_10 = arith.constant 0 : index
    %c0_11 = arith.constant 0 : index
    %21 = vector.load %arg5[%c0_10, %c0_11] : memref<8x512xf32, #tpu.memory_space<vmem>>, vector<8x512xf32>
    tpu.vector_store %arg5[%c0_10, %c0_11], %20 {strides = array<i32>} : memref<8x512xf32, #tpu.memory_space<vmem>>, vector<8x512xf32>,
    %c0_12 = arith.constant 0 : index
    %c0_13 = arith.constant 0 : index
    %22 = vector.load %arg6[%c0_12, %c0_13] : memref<8x512xf32, #tpu.memory_space<vmem>>, vector<8x512xf32>
    %23 = vector.shape_cast %16 : vector<8x512xf32> to vector<1x8x512xf32>
    %cst_14 = arith.constant dense<0.000000e+00> : vector<8x512xf32>
    %24 = vector.multi_reduction <add>, %23, %cst_14 [0] : vector<1x8x512xf32> to vector<8x512xf32>
    %25 = arith.addf %22, %24 : vector<8x512xf32>
    %c0_15 = arith.constant 0 : index
    %c0_16 = arith.constant 0 : index
    %26 = vector.load %arg6[%c0_15, %c0_16] : memref<8x512xf32, #tpu.memory_space<vmem>>, vector<8x512xf32>
    tpu.vector_store %arg6[%c0_15, %c0_16], %25 {strides = array<i32>} : memref<8x512xf32, #tpu.memory_space<vmem>>, vector<8x512xf32>,
    %c0_i32_17 = arith.constant 0 : i32
    %27 = arith.cmpi eq, %arg1, %c0_i32_17 : i32
    %28 = arith.extui %27 : i1 to i32
    %c0_i32_18 = arith.constant 0 : i32
    %29 = arith.cmpi ne, %28, %c0_i32_18 : i32
    scf.if %29 {
      %c0_19 = arith.constant 0 : index
      %c0_20 = arith.constant 0 : index
      %30 = vector.load %arg5[%c0_19, %c0_20] : memref<8x512xf32, #tpu.memory_space<vmem>>, vector<8x512xf32>
      %31 = vector.shape_cast %30 : vector<8x512xf32> to vector<1x8x512xf32>
      %cst_21 = arith.constant dense<0.000000e+00> : vector<1xf32>
      %32 = vector.multi_reduction <add>, %31, %cst_21 [1, 2] : vector<1x8x512xf32> to vector<1xf32>
      %33 = vector.shape_cast %32 : vector<1xf32> to vector<1x1x1xf32>
      %34 = vector.extract %33[0, 0, 0] : f32 from vector<1x1x1xf32>
      %c0_22 = arith.constant 0 : index
      %c0_23 = arith.constant 0 : index
      %35 = vector.load %arg6[%c0_22, %c0_23] : memref<8x512xf32, #tpu.memory_space<vmem>>, vector<8x512xf32>
      %36 = vector.shape_cast %35 : vector<8x512xf32> to vector<1x8x512xf32>
      %cst_24 = arith.constant dense<0.000000e+00> : vector<1xf32>
      %37 = vector.multi_reduction <add>, %36, %cst_24 [1, 2] : vector<1x8x512xf32> to vector<1xf32>
      %38 = vector.shape_cast %37 : vector<1xf32> to vector<1x1x1xf32>
      %39 = vector.extract %38[0, 0, 0] : f32 from vector<1x1x1xf32>
      %40 = tpu.iota {dimensions = array<i32: 1>} : vector<8x128xi32>
      %c0_i32_25 = arith.constant 0 : i32
      %41 = vector.broadcast %c0_i32_25 : i32 to vector<8x128xi32>
      %42 = arith.cmpi eq, %40, %41 : vector<8x128xi32>
      %c1_i32 = arith.constant 1 : i32
      %43 = vector.broadcast %c1_i32 : i32 to vector<8x128xi32>
      %44 = arith.cmpi eq, %40, %43 : vector<8x128xi32>
      %cst_26 = arith.constant 0.000000e+00 : f32
      %45 = vector.broadcast %39 : f32 to vector<8x128xf32>
      %46 = vector.broadcast %cst_26 : f32 to vector<8x128xf32>
      %47 = arith.select %44, %45, %46 : vector<8x128xi1>, vector<8x128xf32>
      %48 = vector.broadcast %34 : f32 to vector<8x128xf32>
      %49 = arith.select %42, %48, %47 : vector<8x128xi1>, vector<8x128xf32>
      %c0_27 = arith.constant 0 : index
      %c0_28 = arith.constant 0 : index
      %50 = vector.load %arg4[%c0_27, %c0_28] : memref<8x128xf32, #tpu.memory_space<vmem>>, vector<8x128xf32>
      tpu.vector_store %arg4[%c0_27, %c0_28], %49 {strides = array<i32>} : memref<8x128xf32, #tpu.memory_space<vmem>>, vector<8x128xf32>,
    } else {
    }
    return
  }
  func.func @transform_0(%arg0: i32, %arg1: i32) -> (i32, i32) {
    %c1_i32 = arith.constant 1 : i32
    %0 = arith.muli %arg0, %c1_i32 : i32
    %1 = arith.addi %0, %arg1 : i32
    %c0_i32 = arith.constant 0 : i32
    %c0_i32_0 = arith.constant 0 : i32
    return %1, %c0_i32 : i32, i32
  }
  func.func @transform_1(%arg0: i32, %arg1: i32) -> (i32, i32) {
    %c1_i32 = arith.constant 1 : i32
    %0 = arith.muli %arg0, %c1_i32 : i32
    %1 = arith.addi %0, %arg1 : i32
    %c0_i32 = arith.constant 0 : i32
    %c0_i32_0 = arith.constant 0 : i32
    return %1, %c0_i32 : i32, i32
  }
  func.func @transform_2(%arg0: i32, %arg1: i32) -> (i32, i32) {
    %c0_i32 = arith.constant 0 : i32
    %c0_i32_0 = arith.constant 0 : i32
    return %arg0, %c0_i32 : i32, i32
  }
}

</mosaic_0001>

<bundles_post_ra>
// kernel: tpu_custom_call.1
= control target key start
LH: loop header
LB: loop body
LE: loop exit
PB: predicated region body
PF: predicated region fallthrough
CT: control target
= control target key end

     0   :  { %7 = vsyncpa [#allocation5], 0  ;;  %s897_s0 = inlined_call_operand.hbm [shape: f32[16,512], index: 0, kind: input, shape index: {}]   ;;  %s898_s1 = inlined_call_operand.hbm [shape: f32[16,512], index: 1, kind: input, shape index: {}]   ;;  %s899_s2 = inlined_call_operand.hbm [shape: f32[16,128], index: 2, kind: output, shape index: {}]  }
   0x1   :  { %9 = vsyncpa [#allocation5 + $0x1], 0 }
   0x2   :  { %10 = vsyncpa [#allocation8], 0 }
   0x3   :  { %12 = vsyncpa [#allocation8 + $0x1], 0 }
   0x4   :  { %13 = vsyncpa [#allocation6], 0 }
   0x5   :  { %15 = vsyncpa [#allocation6 + $0x1], 0  ;;  %s726_s9 = smov 0   ;;  %s728_s10 = smov 0  }
   0x6   :  { %s730_s11 = smov 0   ;;  %s732_s12 = smov 0  }
   0x7   :  { %s734_s13 = smov 0   ;;  %s736_s14 = smov 0  }
   0x8 LB: > { %s467_s15 = sadd.s32 4294967295, %s704_s14   ;;  %s468_s16 = sadd.s32 4294967294, %s704_s14   ;;  %s704_s14 = sphi %s736_s14, %s21_s14   ;;  %s700_s13 = sphi %s734_s13, %s911_s13   ;;  %s696_s12 = sphi %s732_s12, %s910_s12   ;;  %s692_s11 = sphi %s730_s11, %s909_s11   ;;  %s688_s10 = sphi %s728_s10, %s908_s10   ;;  %s684_s9 = sphi %s726_s9, %s907_s9  }
   0x9   : > { %s33_s17 = sadd.s32 1, %s700_s13  ;;  %s42_s18 = sadd.s32 1, %s692_s11 }
   0xa   : > { %p35_p0 = scmp.ge.s32.totalorder %s33_s17, 2  ;;  %p49_p1 = scmp.ne.s32.totalorder %s692_s11, %s688_s10 }
   0xb   : > { %p50_p2 = scmp.eq.s32.totalorder %s704_s14, 0  ;;  %p55_p3 = scmp.ne.s32.totalorder %s688_s10, %s684_s9 }
   0xc   : > { %s913_s17 = smov (%p35_p0, %s33_s17), 0  ;;  %p56_p5 = scmp.eq.s32.totalorder %s467_s15, 0 }
   0xd   : > { %p767_p4 = por %p50_p2, %p49_p1  ;;  %s39_s20 = ssub.s32 %s700_s13, %s913_s17 }
   0xe   : > { %p107_p6 = scmp.eq.s32.totalorder %s467_s15, 1  ;;  %p40_p7 = scmp.eq.s32.totalorder %s39_s20, 0 }
   0xf   : > { %p773_p8 = por %p56_p5, %p55_p3  ;;  %p113_p10 = scmp.eq.s32.totalorder %s468_s16, 1 }
  0x10   : > { %p777_p9 = por %p107_p6, %p49_p1  ;;  %p512_p13 = scmp.lt.s32.totalorder %s704_s14, 2 }
  0x11   : > { %s782_s23 = scalar_select %p40_p7, %s692_s11, %s42_s18  }
  0x12   : > { %p784_p11 = por %p113_p10, %p55_p3  ;;  %s791_s25 = sand.u32 1, %s692_s11  }
  0x13   : > { %s471_s26 = sshll.u32 %s791_s25, 5  ;;  %s489_s27 = sshll.u32 %s700_s13, 9 }
  0x14   : > { %s144_s30 = scalar_lea.hbm %s897_s0, %s489_s27  ;;  %s137_s3 = scalar_lea.vmem [#allocation4], %s471_s26 }
  0x15   : > { %s146_s4 = sshll.u32 %s137_s3, 4  ;;  %p800_p0 = pnand %p512_p13, %p767_p4  ;;  %s147_s4 = int_to_ptr.vmem [resolvable:$true] %s146_s4 }
  0x16   : > { %p477_p1 = scmp.ge.s32.totalorder %s704_s14, 1  ;;  %p171_p2 = scmp.lt.s32.totalorder %s704_s14, 3 }
  0x17   : > { %s134_s6 = scalar_lea.sflag [#allocation5], %s791_s25  ;;  %p566_p3 = pneg %p800_p0 }
  0x18   : > { %s577_s7 = scalar_lea.vmem %s147_s4, 512  ;;  %s706_s8 = smov [#allocation4]  }
  0x19   : > { %p578_p5 = scmp.ne.s32.totalorder %s147_s4, %s577_s7  ;;  %s582_s15 = sshll.u32 %s706_s8, 4  ;;  %s583_s15 = int_to_ptr.vmem [resolvable:$false] %s582_s15 }
  0x1a   : > { %s584_s16 = scalar_lea.vmem %s583_s15, 1024  ;;  %p585_p4 = scmp.lt.s32.totalorder %s147_s4, %s583_s15 }
  0x1b   : > { %p580_p6 = pnand %p578_p5, %p566_p3  ;;  %p586_p10 = scmp.lt.s32.totalorder %s584_s16, %s577_s7 }
  0x1d   : > { %p581_p7 = pneg %p580_p6  ;;  %p587_p13 = por %p586_p10, %p585_p4 }
  0x1f   : > { %p588_p12 = pnand %p587_p13, %p581_p7 }
  0x21   : > { %591 = shalt.err (!%p588_p12)
}
  0x22   : > { %504 = dma.hbm_to_vmem [thread:$0]  (!%p800_p0), %s144_s30, 512, %s147_s4, %s134_s6  }
  0x23   : > { %p818_p5 = pnand %p477_p1, %p171_p2  ;;  %s164_s28 = scalar_lea.hbm %s898_s1, %s489_s27 }
  0x24   : > { %s157_s29 = scalar_lea.vmem [#allocation7], %s471_s26  ;;  %s154_s7 = scalar_lea.sflag [#allocation8], %s791_s25 }
  0x25   : > { %s166_s3 = sshll.u32 %s157_s29, 4  ;;  %s707_s30 = smov [#allocation7]   ;;  %s167_s3 = int_to_ptr.vmem [resolvable:$true] %s166_s3 }
  0x26   : > { %s605_s8 = scalar_lea.vmem %s167_s3, 512  ;;  %s610_s4 = sshll.u32 %s707_s30, 4  ;;  %s611_s4 = int_to_ptr.vmem [resolvable:$false] %s610_s4 }
  0x27   : > { %p606_p12 = scmp.ne.s32.totalorder %s167_s3, %s605_s8  ;;  %s612_s6 = scalar_lea.vmem %s611_s4, 1024 }
  0x28   : > { %p613_p1 = scmp.lt.s32.totalorder %s167_s3, %s611_s4  ;;  %p614_p2 = scmp.lt.s32.totalorder %s612_s6, %s605_s8 }
  0x29   : > { %p608_p6 = pnand %p606_p12, %p566_p3 }
  0x2a   : > { %p615_p4 = por %p614_p2, %p613_p1 }
  0x2b   : > { %p609_p7 = pneg %p608_p6 }
  0x2d   : > { %p616_p10 = pnand %p615_p4, %p609_p7 }
  0x2f   : > { %619 = shalt.err (!%p616_p10)
}
  0x30   : > { %507 = dma.hbm_to_vmem [thread:$0]  (!%p800_p0), %s164_s28, 512, %s167_s3, %s154_s7  }
  0x31   : > { %175 = sbr.rel (%p818_p5) target bundleno = 292 (0x124), region = 28  ;;  %s834_s25 = sand.u32 (!%p818_p5), 1, %s688_s10  }
  0x32   : > { %s478_s26 = sshll.u32 (!%p818_p5), %s834_s25, 5  ;;  %s178_s27 = scalar_lea.sflag (!%p818_p5), [#allocation5], %s834_s25 }
  0x33   : > { %s181_s15 = scalar_lea.vmem (!%p818_p5), [#allocation4], %s478_s26 }
  0x36   : > { %671 = dma.done.wait (%p773_p8), %s178_s27, 512  }
  0x37   : > { %673 = vsyncadd (%p773_p8), %s178_s27, 4294966784  ;;  %s187_s5 = scalar_lea.sflag [#allocation8], %s834_s25  ;;  %s190_s16 = scalar_lea.vmem [#allocation7], %s478_s26 }
  0x38   : > { %675 = dma.done.wait (%p773_p8), %s187_s5, 512  }
  0x39   : > { %677 = vsyncadd (%p773_p8), %s187_s5, 4294966784  ;;  %v230_v0 = vld [vmem:[%s181_s15] sm:$0xff]  ;;  %v231_v1 = vld [vmem:[%s181_s15 + $0x8] sm:$0xff]  ;;  %vm708_vm12 = vmmov 1   ;;  %v709_v21 = vmov 0.0   ;;  %v341_v45 = vlaneseq  ;;  %s480_s21 = sshll.u32 %s834_s25, 3 }
  0x3a   : > { %v232_v2 = vld [vmem:[%s181_s15 + $0x10] sm:$0xff]  ;;  %v233_v3 = vld [vmem:[%s181_s15 + $0x18] sm:$0xff]  ;;  %v234_v4 = vld [vmem:[%s190_s16] sm:$0xff]  ;;  %vm254_vm0 = vcmp.gt.f32.partialorder %v230_v0, 0.5  ;;  %vm255_vm1 = vcmp.gt.f32.partialorder %v231_v1, 0.5  ;;  %s486_s18 = sshll.u32 %s696_s12, 7 }
  0x3b   : > { %v235_v5 = vld [vmem:[%s190_s16 + $0x8] sm:$0xff]  ;;  %vm256_vm2 = vcmp.gt.f32.partialorder %v232_v2, 0.5  ;;  %v236_v6 = vld [vmem:[%s190_s16 + $0x10] sm:$0xff]  ;;  %v237_v7 = vld [vmem:[%s190_s16 + $0x18] sm:$0xff]  ;;  %v238_v8 = vmul.f32 100.0, %v234_v4  ;;  %vm257_vm3 = vcmp.gt.f32.partialorder %v233_v3, 0.5  ;;  %s855_s8 = scalar_lea.hbm %s899_s2, %s486_s18 }
  0x3c   : > { %v239_v9 = vmul.f32 100.0, %v235_v5  ;;  %vm250_vm4 = vcmp.gt.f32.partialorder %v234_v4, 0.5  ;;  %v240_v10 = vmul.f32 100.0, %v236_v6  ;;  %v241_v11 = vmul.f32 100.0, %v237_v7  ;;  %s215_s20 = scalar_lea.vmem [#allocation9], %s480_s21  ;;  %s351_s30 = scalar_lea.sflag [#allocation6], %s834_s25 }
  0x3d   : > { %vm251_vm5 = vcmp.gt.f32.partialorder %v235_v5, 0.5  ;;  %vm252_vm6 = vcmp.gt.f32.partialorder %v236_v6, 0.5  ;;  %vm258_vm7 = vmxor %vm250_vm4, %vm254_vm0  ;;  %v242_v12 = vsub.f32 %v238_v8, %v230_v0  ;;  %vm253_vm8 = vcmp.gt.f32.partialorder %v237_v7, 0.5  ;;  %s364_s28 = sshll.u32 %s215_s20, 4  ;;  %s710_s4 = smov [#allocation9]   ;;  %s365_s28 = int_to_ptr.vmem [resolvable:$true] %s364_s28 }
  0x3e   : > { %v243_v13 = vsub.f32 %v239_v9, %v231_v1  ;;  %vm259_vm9 = vmxor %vm251_vm5, %vm255_vm1  ;;  %v244_v14 = vsub.f32 %v240_v10, %v232_v2  ;;  %v245_v15 = vsub.f32 %v241_v11, %v233_v3  ;;  %v342_v46 = vand.u32 127, %v341_v45  ;;  %s620_s12 = scalar_lea.vmem %s365_s28, 128  ;;  %s624_s6 = sshll.u32 %s710_s4, 4  ;;  %s625_s6 = int_to_ptr.vmem [resolvable:$false] %s624_s6 }
  0x3f   : > { %vm260_vm10 = vmxor %vm252_vm6, %vm256_vm2  ;;  %v246_v16 = vmul.f32 %v242_v12, %v242_v12  ;;  %p621_p8 = scmp.ne.s32.totalorder %s365_s28, %s620_s12  ;;  %s626_s26 = scalar_lea.vmem %s625_s6, 256 }
  0x40   : > { %v247_v17 = vmul.f32 %v243_v13, %v243_v13  ;;  %vm261_vm11 = vmxor %vm253_vm8, %vm257_vm3  ;;  %v248_v18 = vmul.f32 %v244_v14, %v244_v14  ;;  %v249_v19 = vmul.f32 %v245_v15, %v245_v15  ;;  %vm344_vm1 = vcmp.eq.s32.totalorder %v342_v46, 1  ;;  %p627_p13 = scmp.lt.s32.totalorder %s365_s28, %s625_s6  ;;  %p628_p5 = scmp.lt.s32.totalorder %s626_s26, %s620_s12 }
  0x41   : > { %vm262_vm13 = vmxor %vm258_vm7, %vm708_vm12  ;;  %vm343_vm2 = vcmp.eq.s32.totalorder %v342_v46, 0  ;;  %p622_p0 = pnand %p621_p8, %p777_p9 }
  0x42   : > { %v313_v20 = vadd.f32 %v247_v17, %v246_v16  ;;  %vm263_vm14 = vmxor %vm259_vm9, %vm708_vm12  ;;  %v481_v22 = vsel %vm262_vm13, 1.0, %v709_v21  ;;  %p629_p12 = por %p628_p5, %p627_p13 }
  0x43   : > { %vm264_vm15 = vmxor %vm260_vm10, %vm708_vm12  ;;  %v482_v23 = vsel %vm263_vm14, 1.0, %v709_v21  ;;  %p623_p3 = pneg %p622_p0 }
  0x44   : > { %v314_v24 = vadd.f32 %v313_v20, %v248_v18  ;;  %vm265_vm0 = vmxor %vm261_vm11, %vm708_vm12  ;;  %v483_v25 = vsel %vm264_vm15, 1.0, %v709_v21  ;;  %v329_v26 = vadd.f32 %v482_v23, %v481_v22 }
  0x45   : > { %v484_v27 = vsel %vm265_vm0, 1.0, %v709_v21  ;;  %p630_p6 = pnand %p629_p12, %p623_p3 }
  0x46   : > { %v315_v28 = vadd.f32 %v314_v24, %v249_v19  ;;  %v330_v29 = vadd.f32 %v483_v25, %v329_v26 }
  0x48   : > { %316 = vadd.xlane.f32.xlu0 %v315_v28  ;;  %v331_v30 = vadd.f32 %v484_v27, %v330_v29 }
  0x4c   : > { %332 = vadd.xlane.f32.xlu0 %v331_v30 }
  0xd1   : > { %v317_v31 = vpop.xlane.xlu0 %316 }
  0xd2   : > { %v318_v32 = vrot.slane %v317_v31, 4 }
  0xd4   : > { %v319_v33 = vadd.f32 %v318_v32, %v317_v31 }
  0xd5   : > { %v333_v34 = vpop.xlane.xlu0 %332 }
  0xd6   : > { %v320_v35 = vrot.slane %v319_v33, 2  ;;  %v334_v36 = vrot.slane %v333_v34, 4 }
  0xd8   : > { %v335_v37 = vadd.f32 %v334_v36, %v333_v34  ;;  %v321_v38 = vadd.f32 %v320_v35, %v319_v33 }
  0xda   : > { %v336_v39 = vrot.slane %v335_v37, 2  ;;  %v322_v40 = vrot.slane %v321_v38, 1 }
  0xdc   : > { %v337_v41 = vadd.f32 %v336_v39, %v335_v37  ;;  %v323_v42 = vadd.f32 %v322_v40, %v321_v38 }
  0xde   : > { %491 = vpush %v323_v42  ;;  %v338_v43 = vrot.slane %v337_v41, 1 }
  0xe0   : > { %v339_v44 = vadd.f32 %v338_v43, %v337_v41 }
  0xe2   : > { %493 = vpush %v339_v44 }
 0x10f   : > { %s492_s19 = spop %491 }
 0x110   : > { %v347_v48 = vstv %s492_s19 }
 0x113   : > { %s494_s29 = spop %493 }
 0x114   : > { %v345_v47 = vstv %s494_s29 }
 0x115   : > { %v346_v49 = vsel %vm344_vm1, %v345_v47, 0.0 }
 0x116   : > { %v348_v50 = vsel %vm343_vm2, %v347_v48, %v346_v49 }
 0x117   : > { %349 = vst [vmem:[%s215_s20] sm:$0xff] %v348_v50 }
 0x118   : > { %633 = shalt.err (!%p630_p6)
}
 0x119   : > { %s634_s27 = scalar_lea.hbm %s855_s8, 128  ;;  %s638_s5 = scalar_lea.hbm %s899_s2, 256 }
 0x11a   : > { %p635_p7 = scmp.ne.s32.totalorder %s855_s8, %s634_s27  ;;  %p639_p4 = scmp.lt.s32.totalorder %s855_s8, %s899_s2 }
 0x11b   : > { %p640_p10 = scmp.lt.s32.totalorder %s638_s5, %s634_s27 }
 0x11c   : > { %p636_p1 = pnand %p635_p7, %p777_p9 }
 0x11d   : > { %p641_p8 = por %p640_p10, %p639_p4 }
 0x11e   : > { %p637_p2 = pneg %p636_p1 }
 0x120   : > { %p642_p0 = pnand %p641_p8, %p637_p2 }
 0x122   : > { %645 = shalt.err (!%p642_p0)
}
 0x123   : > { %499 = dma.vmem_to_hbm [thread:$0]  (%p777_p9), %s365_s28, 128, %s855_s8, %s351_s30  }
 0x124 PF: > { %s376_s18 = sand.u32 1, %s684_s9   ;;  %p906_p3 = scmp.ge.s32.totalorder %s704_s14, 2 }
 0x125   : > { %s377_s19 = scalar_lea.sflag [#allocation6], %s376_s18 }
 0x126   : > { %p509_p13 = pnand %p906_p3, %p784_p11 }
 0x128   : > { %p510_p5 = pneg %p509_p13 }
 0x12a   : > { %679 = dma.done.wait (%p510_p5), %s377_s19, 128  }
 0x12b   : > { %681 = vsyncadd (%p510_p5), %s377_s19, 4294967168  ;;  %s21_s14 = sadd.s32 1, %s704_s14   ;;  %s907_s9 = smov %s688_s10 }
 0x12c   : > { %p18_p12 = scmp.ge.s32.totalorder %s21_s14, 4   ;;  %s908_s10 = smov %s692_s11 }
 0x12d   : > { %s909_s11 = smov %s782_s23  ;;  %s910_s12 = smov %s700_s13 }
 0x12e   : > { %s911_s13 = smov %s913_s17  ;;  %20 = sbr.rel (!%p18_p12) target bundleno = 8 (0x8), region = 94 }
 0x133   :  { %382 = vsyncpa [#allocation5], 1 }
 0x134   :  { %384 = vsyncpa [#allocation5 + $0x1], 1 }
 0x135   :  { %385 = vsyncpa [#allocation8], 1 }
 0x136   :  { %387 = vsyncpa [#allocation8 + $0x1], 1 }
 0x137   :  { %388 = vsyncpa [#allocation6], 1 }
 0x138   :  { %390 = vsyncpa [#allocation6 + $0x1], 1 }

</bundles_post_ra>
